<compile_context>
chip_gen: v6e
topology: v6e:2x2x1
jax: 0.10.0
libtpu: 0.0.40
codegen_flags: <defaults>
</compile_context>

<pallas_src>
import jax
import jax.numpy as jnp
from jax.experimental import pallas as pl
from jax.experimental.pallas import tpu as pltpu

NEG_SLOPE = 0.01        # PyTorch nn.LeakyReLU default
SUBLANE_BF16 = 16       # sublane packing granularity for bf16 tiles
DEFAULT_TILE_B = 2048   # large batch tile to amortize per-step overhead


def _round_up(n, m):
    return ((n + m - 1) // m) * m


def _leaky_relu(h):
    return jnp.where(h > 0, h, NEG_SLOPE * h)


def mlp_g_kernel(x_ref,
                 w0_ref, b0_ref,
                 w1_ref, b1_ref,
                 w2_ref, b2_ref,
                 w3_ref, b3_ref,
                 o_ref):
    """Fused 4-layer MLP forward for one batch tile.

    x and weights arrive pre-cast to bf16; biases are f32 rows.  Matmuls run
    on the MXU in bf16 with f32 accumulation; bias-add / LeakyReLU stay f32.
    """
    # Hoist the bias reads (once per grid step).
    b0 = b0_ref[...]
    b1 = b1_ref[...]
    b2 = b2_ref[...]
    b3 = b3_ref[...]

    h = jnp.dot(x_ref[...], w0_ref[...],
                preferred_element_type=jnp.float32) + b0
    h = _leaky_relu(h)

    h = jnp.dot(h.astype(jnp.bfloat16), w1_ref[...],
                preferred_element_type=jnp.float32) + b1
    h = _leaky_relu(h)

    h = jnp.dot(h.astype(jnp.bfloat16), w2_ref[...],
                preferred_element_type=jnp.float32) + b2
    h = _leaky_relu(h)

    out = jnp.dot(h.astype(jnp.bfloat16), w3_ref[...],
                  preferred_element_type=jnp.float32) + b3
    o_ref[...] = out.astype(o_ref.dtype)


def prepare_mlp_g_params(raw_params):
    """One-time conversion of params: weights -> bf16, biases -> f32 (1, fo) rows.

    raw_params: list of (W, b) with W shaped (in_features, out_features)
    (already transposed vs. PyTorch) and b broadcastable to (1, out_features).
    """
    prepared = []
    for w, b in raw_params:
        prepared.append((jnp.asarray(w, jnp.bfloat16),
                         jnp.asarray(b, jnp.float32).reshape(1, -1)))
    return prepared


def _choose_tile_b(batch, tile_b):
    """Pick the batch tile: full-array block for small batches, otherwise a
    large tile (multiple of 16) that still leaves >=2 grid steps (v7x has two
    TensorCores to shard the 'parallel' batch axis across)."""
    if batch <= tile_b:
        return batch                       # single block == full array dims (always legal)
    tb = min(tile_b, _round_up(pl.cdiv(batch, 2), SUBLANE_BF16))
    return _round_up(tb, SUBLANE_BF16)


def mlp_g_forward(x, params, *, tile_b=DEFAULT_TILE_B):
    """Run the fused MLP_G forward.

    params: output of prepare_mlp_g_params (4 layers: 3 hidden + output).
    Returns an array of shape (B, out_size) with x.dtype.
    """
    assert len(params) == 4, "kernel is fused for hidden_layers=3 + output layer"
    B, d_in = x.shape
    out_size = params[-1][0].shape[1]
    out_dtype = x.dtype

    # Ship the activations to the kernel as bf16 (halves the dominant HBM stream).
    x_bf16 = x.astype(jnp.bfloat16)

    tb = _choose_tile_b(B, tile_b)
    grid = (pl.cdiv(B, tb),)

    flat_args = [x_bf16]
    # x: unpadded — last dim equals the full array dim (d_in), so no 128-lane pad needed.
    in_specs = [pl.BlockSpec((tb, d_in), lambda i: (i, 0))]
    for w, b in params:
        fi, fo = w.shape
        flat_args.extend([w, b])
        # Weights / biases: full-array blocks, VMEM-resident across all grid steps.
        in_specs.append(pl.BlockSpec((fi, fo), lambda i: (0, 0)))
        in_specs.append(pl.BlockSpec((1, fo), lambda i: (0, 0)))

    out = pl.pallas_call(
        mlp_g_kernel,
        out_shape=jax.ShapeDtypeStruct((B, out_size), out_dtype),
        grid=grid,
        in_specs=in_specs,
        # Unpadded output: narrow masked store, but ~8x less HBM writeback and
        # no wrapper-side slice pass.  Tail-block writeback is clipped to B rows.
        out_specs=pl.BlockSpec((tb, out_size), lambda i: (i, 0)),
        compiler_params=pltpu.CompilerParams(
            dimension_semantics=("parallel",)),
    )(*flat_args)
    return out


def init_mlp_g_params(key, input_size, output_size, layer_size=128,
                      hidden_layers=3, dtype=jnp.float32):
    """Deterministic init mimicking PyTorch nn.Linear default:
    U(-1/sqrt(fan_in), 1/sqrt(fan_in)) for both weights and biases."""
    dims = []
    for i in range(hidden_layers):
        dims.append((input_size if i == 0 else layer_size, layer_size))
    dims.append((layer_size if hidden_layers != 0 else input_size, output_size))

    params = []
    for (fan_in, fan_out) in dims:
        key, kw, kb = jax.random.split(key, 3)
        bound = 1.0 / (fan_in ** 0.5)
        w = jax.random.uniform(kw, (fan_in, fan_out), dtype, -bound, bound)
        b = jax.random.uniform(kb, (1, fan_out), dtype, -bound, bound)
        params.append((w, b))
    return params


def mlp_g_reference(x, params, *, bf16_matmul=False):
    """Plain-JAX reference of the same forward pass (params = raw f32 list)."""
    h = x.astype(jnp.float32)
    for i, (w, b) in enumerate(params):
        if bf16_matmul:
            h = jnp.dot(h.astype(jnp.bfloat16), w.astype(jnp.bfloat16),
                        preferred_element_type=jnp.float32) + b.astype(jnp.float32)
        else:
            h = h @ w + b
        if i != len(params) - 1:
            h = jnp.where(h > 0, h, NEG_SLOPE * h)
    return h.astype(x.dtype)


if __name__ == "__main__":
    key = jax.random.PRNGKey(0)
    k_x, k_p, k_x2 = jax.random.split(key, 3)

    batch = 8
    input_size = 32
    output_size = 16
    layer_size = 128
    hidden_layers = 3

    raw_params = init_mlp_g_params(k_p, input_size, output_size,
                                   layer_size, hidden_layers)
    params = prepare_mlp_g_params(raw_params)   # one-time bf16/f32 conversion

    # --- small demo batch (single grid step, full-array blocks) -------------
    x = jax.random.normal(k_x, (batch, input_size), dtype=jnp.float32)
    out = jax.block_until_ready(mlp_g_forward(x, params))
    assert out.shape == (batch, output_size)
    ref_bf16 = mlp_g_reference(x, raw_params, bf16_matmul=True)
    ref_f32 = mlp_g_reference(x, raw_params, bf16_matmul=False)
    assert jnp.allclose(out, ref_bf16, atol=1e-2, rtol=1e-2)
    assert jnp.allclose(out, ref_f32, atol=5e-2, rtol=5e-2)

    # --- larger ragged batch (multi-step grid + clipped tail block) ---------
    batch2 = 260
    x2 = jax.random.normal(k_x2, (batch2, input_size), dtype=jnp.float32)
    out2 = jax.block_until_ready(mlp_g_forward(x2, params, tile_b=128))
    assert out2.shape == (batch2, output_size)
    ref2 = mlp_g_reference(x2, raw_params, bf16_matmul=True)
    assert jnp.allclose(out2, ref2, atol=1e-2, rtol=1e-2)

    # --- default (large) tile path on a mid-size batch ----------------------
    batch3 = 1000
    x3 = jax.random.normal(k_x2, (batch3, input_size), dtype=jnp.float32)
    out3 = jax.block_until_ready(mlp_g_forward(x3, params))
    assert out3.shape == (batch3, output_size)
    ref3 = mlp_g_reference(x3, raw_params, bf16_matmul=True)
    assert jnp.allclose(out3, ref3, atol=1e-2, rtol=1e-2)

    print("KERNEL_OK")
</pallas_src>

<mosaic_0001>
module attributes {stable_mosaic.version = 11 : i64} {
  func.func @mlp_g_kernel(%arg0: i32, %arg1: memref<8x32xbf16, #tpu.memory_space<vmem>>, %arg2: memref<32x128xbf16, #tpu.memory_space<vmem>>, %arg3: memref<1x128xf32, #tpu.memory_space<vmem>>, %arg4: memref<128x128xbf16, #tpu.memory_space<vmem>>, %arg5: memref<1x128xf32, #tpu.memory_space<vmem>>, %arg6: memref<128x128xbf16, #tpu.memory_space<vmem>>, %arg7: memref<1x128xf32, #tpu.memory_space<vmem>>, %arg8: memref<128x16xbf16, #tpu.memory_space<vmem>>, %arg9: memref<1x16xf32, #tpu.memory_space<vmem>>, %arg10: memref<8x16xf32, #tpu.memory_space<vmem>>) attributes {dimension_semantics = [#tpu.dimension_semantics<parallel>], iteration_bounds = array<i64: 1>, scalar_prefetch = 0 : i64, scratch_operands = 0 : i64, tpu.core_type = #tpu.core_type<tc>, window_params = [{transform_indices = @transform_0, window_bounds = array<i64: 8, 32>}, {pipeline_mode = #tpu.pipeline_mode<synchronous>, transform_indices = @transform_1, window_bounds = array<i64: 32, 128>}, {pipeline_mode = #tpu.pipeline_mode<synchronous>, transform_indices = @transform_2, window_bounds = array<i64: 1, 128>}, {pipeline_mode = #tpu.pipeline_mode<synchronous>, transform_indices = @transform_3, window_bounds = array<i64: 128, 128>}, {pipeline_mode = #tpu.pipeline_mode<synchronous>, transform_indices = @transform_4, window_bounds = array<i64: 1, 128>}, {pipeline_mode = #tpu.pipeline_mode<synchronous>, transform_indices = @transform_5, window_bounds = array<i64: 128, 128>}, {pipeline_mode = #tpu.pipeline_mode<synchronous>, transform_indices = @transform_6, window_bounds = array<i64: 1, 128>}, {pipeline_mode = #tpu.pipeline_mode<synchronous>, transform_indices = @transform_7, window_bounds = array<i64: 128, 16>}, {pipeline_mode = #tpu.pipeline_mode<synchronous>, transform_indices = @transform_8, window_bounds = array<i64: 1, 16>}, {transform_indices = @transform_9, window_bounds = array<i64: 8, 16>}]} {
    %c0 = arith.constant 0 : index
    %c0_0 = arith.constant 0 : index
    %0 = vector.load %arg3[%c0, %c0_0] : memref<1x128xf32, #tpu.memory_space<vmem>>, vector<1x128xf32>
    %c0_1 = arith.constant 0 : index
    %c0_2 = arith.constant 0 : index
    %1 = vector.load %arg5[%c0_1, %c0_2] : memref<1x128xf32, #tpu.memory_space<vmem>>, vector<1x128xf32>
    %c0_3 = arith.constant 0 : index
    %c0_4 = arith.constant 0 : index
    %2 = vector.load %arg7[%c0_3, %c0_4] : memref<1x128xf32, #tpu.memory_space<vmem>>, vector<1x128xf32>
    %c0_5 = arith.constant 0 : index
    %c0_6 = arith.constant 0 : index
    %3 = vector.load %arg9[%c0_5, %c0_6] : memref<1x16xf32, #tpu.memory_space<vmem>>, vector<1x16xf32>
    %c0_7 = arith.constant 0 : index
    %c0_8 = arith.constant 0 : index
    %4 = vector.load %arg1[%c0_7, %c0_8] : memref<8x32xbf16, #tpu.memory_space<vmem>>, vector<8x32xbf16>
    %c0_9 = arith.constant 0 : index
    %c0_10 = arith.constant 0 : index
    %5 = vector.load %arg2[%c0_9, %c0_10] : memref<32x128xbf16, #tpu.memory_space<vmem>>, vector<32x128xbf16>
    %cst = arith.constant dense<0.000000e+00> : vector<8x128xf32>
    %6 = tpu.matmul %4, %5, %cst {dimension_numbers = #tpu.dot_dimension_numbers<[1], [0], [0], [1], [0, 0, 1, 1], [], []>} : vector<8x32xbf16>, vector<32x128xbf16>, vector<8x128xf32> -> vector<8x128xf32>
    %7 = vector.broadcast %0 : vector<1x128xf32> to vector<8x128xf32>
    %8 = arith.addf %6, %7 : vector<8x128xf32>
    %cst_11 = arith.constant 0.000000e+00 : f32
    %9 = vector.broadcast %cst_11 : f32 to vector<8x128xf32>
    %10 = arith.cmpf ogt, %8, %9 : vector<8x128xf32>
    %cst_12 = arith.constant 0.00999999977 : f32
    %11 = vector.broadcast %cst_12 : f32 to vector<8x128xf32>
    %12 = arith.mulf %11, %8 : vector<8x128xf32>
    %13 = arith.select %10, %8, %12 : vector<8x128xi1>, vector<8x128xf32>
    %14 = arith.truncf %13 : vector<8x128xf32> to vector<8x128xbf16>
    %c0_13 = arith.constant 0 : index
    %c0_14 = arith.constant 0 : index
    %15 = vector.load %arg4[%c0_13, %c0_14] : memref<128x128xbf16, #tpu.memory_space<vmem>>, vector<128x128xbf16>
    %cst_15 = arith.constant dense<0.000000e+00> : vector<8x128xf32>
    %16 = tpu.matmul %14, %15, %cst_15 {dimension_numbers = #tpu.dot_dimension_numbers<[1], [0], [0], [1], [0, 0, 1, 1], [], []>} : vector<8x128xbf16>, vector<128x128xbf16>, vector<8x128xf32> -> vector<8x128xf32>
    %17 = vector.broadcast %1 : vector<1x128xf32> to vector<8x128xf32>
    %18 = arith.addf %16, %17 : vector<8x128xf32>
    %cst_16 = arith.constant 0.000000e+00 : f32
    %19 = vector.broadcast %cst_16 : f32 to vector<8x128xf32>
    %20 = arith.cmpf ogt, %18, %19 : vector<8x128xf32>
    %cst_17 = arith.constant 0.00999999977 : f32
    %21 = vector.broadcast %cst_17 : f32 to vector<8x128xf32>
    %22 = arith.mulf %21, %18 : vector<8x128xf32>
    %23 = arith.select %20, %18, %22 : vector<8x128xi1>, vector<8x128xf32>
    %24 = arith.truncf %23 : vector<8x128xf32> to vector<8x128xbf16>
    %c0_18 = arith.constant 0 : index
    %c0_19 = arith.constant 0 : index
    %25 = vector.load %arg6[%c0_18, %c0_19] : memref<128x128xbf16, #tpu.memory_space<vmem>>, vector<128x128xbf16>
    %cst_20 = arith.constant dense<0.000000e+00> : vector<8x128xf32>
    %26 = tpu.matmul %24, %25, %cst_20 {dimension_numbers = #tpu.dot_dimension_numbers<[1], [0], [0], [1], [0, 0, 1, 1], [], []>} : vector<8x128xbf16>, vector<128x128xbf16>, vector<8x128xf32> -> vector<8x128xf32>
    %27 = vector.broadcast %2 : vector<1x128xf32> to vector<8x128xf32>
    %28 = arith.addf %26, %27 : vector<8x128xf32>
    %cst_21 = arith.constant 0.000000e+00 : f32
    %29 = vector.broadcast %cst_21 : f32 to vector<8x128xf32>
    %30 = arith.cmpf ogt, %28, %29 : vector<8x128xf32>
    %cst_22 = arith.constant 0.00999999977 : f32
    %31 = vector.broadcast %cst_22 : f32 to vector<8x128xf32>
    %32 = arith.mulf %31, %28 : vector<8x128xf32>
    %33 = arith.select %30, %28, %32 : vector<8x128xi1>, vector<8x128xf32>
    %34 = arith.truncf %33 : vector<8x128xf32> to vector<8x128xbf16>
    %c0_23 = arith.constant 0 : index
    %c0_24 = arith.constant 0 : index
    %35 = vector.load %arg8[%c0_23, %c0_24] : memref<128x16xbf16, #tpu.memory_space<vmem>>, vector<128x16xbf16>
    %cst_25 = arith.constant dense<0.000000e+00> : vector<8x16xf32>
    %36 = tpu.matmul %34, %35, %cst_25 {dimension_numbers = #tpu.dot_dimension_numbers<[1], [0], [0], [1], [0, 0, 1, 1], [], []>} : vector<8x128xbf16>, vector<128x16xbf16>, vector<8x16xf32> -> vector<8x16xf32>
    %37 = vector.broadcast %3 : vector<1x16xf32> to vector<8x16xf32>
    %38 = arith.addf %36, %37 : vector<8x16xf32>
    %c0_26 = arith.constant 0 : index
    %c0_27 = arith.constant 0 : index
    %39 = vector.load %arg10[%c0_26, %c0_27] : memref<8x16xf32, #tpu.memory_space<vmem>>, vector<8x16xf32>
    tpu.vector_store %arg10[%c0_26, %c0_27], %38 {strides = array<i32>} : memref<8x16xf32, #tpu.memory_space<vmem>>, vector<8x16xf32>,
    return
  }
  func.func @transform_0(%arg0: i32) -> (i32, i32) {
    %c0_i32 = arith.constant 0 : i32
    %c0_i32_0 = arith.constant 0 : i32
    return %arg0, %c0_i32 : i32, i32
  }
  func.func @transform_1(%arg0: i32) -> (i32, i32) {
    %c0_i32 = arith.constant 0 : i32
    %c0_i32_0 = arith.constant 0 : i32
    %c0_i32_1 = arith.constant 0 : i32
    return %c0_i32, %c0_i32_0 : i32, i32
  }
  func.func @transform_2(%arg0: i32) -> (i32, i32) {
    %c0_i32 = arith.constant 0 : i32
    %c0_i32_0 = arith.constant 0 : i32
    %c0_i32_1 = arith.constant 0 : i32
    return %c0_i32, %c0_i32_0 : i32, i32
  }
  func.func @transform_3(%arg0: i32) -> (i32, i32) {
    %c0_i32 = arith.constant 0 : i32
    %c0_i32_0 = arith.constant 0 : i32
    %c0_i32_1 = arith.constant 0 : i32
    return %c0_i32, %c0_i32_0 : i32, i32
  }
  func.func @transform_4(%arg0: i32) -> (i32, i32) {
    %c0_i32 = arith.constant 0 : i32
    %c0_i32_0 = arith.constant 0 : i32
    %c0_i32_1 = arith.constant 0 : i32
    return %c0_i32, %c0_i32_0 : i32, i32
  }
  func.func @transform_5(%arg0: i32) -> (i32, i32) {
    %c0_i32 = arith.constant 0 : i32
    %c0_i32_0 = arith.constant 0 : i32
    %c0_i32_1 = arith.constant 0 : i32
    return %c0_i32, %c0_i32_0 : i32, i32
  }
  func.func @transform_6(%arg0: i32) -> (i32, i32) {
    %c0_i32 = arith.constant 0 : i32
    %c0_i32_0 = arith.constant 0 : i32
    %c0_i32_1 = arith.constant 0 : i32
    return %c0_i32, %c0_i32_0 : i32, i32
  }
  func.func @transform_7(%arg0: i32) -> (i32, i32) {
    %c0_i32 = arith.constant 0 : i32
    %c0_i32_0 = arith.constant 0 : i32
    %c0_i32_1 = arith.constant 0 : i32
    return %c0_i32, %c0_i32_0 : i32, i32
  }
  func.func @transform_8(%arg0: i32) -> (i32, i32) {
    %c0_i32 = arith.constant 0 : i32
    %c0_i32_0 = arith.constant 0 : i32
    %c0_i32_1 = arith.constant 0 : i32
    return %c0_i32, %c0_i32_0 : i32, i32
  }
  func.func @transform_9(%arg0: i32) -> (i32, i32) {
    %c0_i32 = arith.constant 0 : i32
    %c0_i32_0 = arith.constant 0 : i32
    return %arg0, %c0_i32 : i32, i32
  }
}

</mosaic_0001>

<bundles_post_ra>
// kernel: tpu_custom_call.1
= control target key start
LH: loop header
LB: loop body
LE: loop exit
PB: predicated region body
PF: predicated region fallthrough
CT: control target
= control target key end

     0   :  { %14 = vsyncpa [#allocation3], 0  ;;  %s884_s0 = inlined_call_operand.vmem [shape: bf16[8,32], index: 0, kind: input, shape index: {}]   ;;  %s885_s1 = inlined_call_operand.hbm [shape: bf16[32,128], index: 1, kind: input, shape index: {}]   ;;  %s886_s2 = inlined_call_operand.vmem [shape: f32[1,128], index: 2, kind: input, shape index: {}]   ;;  %s887_s3 = inlined_call_operand.vmem [shape: bf16[128,128], index: 3, kind: input, shape index: {}]   ;;  %s888_s4 = inlined_call_operand.vmem [shape: f32[1,128], index: 4, kind: input, shape index: {}]   ;;  %s889_s5 = inlined_call_operand.hbm [shape: bf16[128,128], index: 5, kind: input, shape index: {}]   ;;  %s890_s6 = inlined_call_operand.vmem [shape: f32[1,128], index: 6, kind: input, shape index: {}]   ;;  %s891_s7 = inlined_call_operand.vmem [shape: bf16[128,16], index: 7, kind: input, shape index: {}]   ;;  %s892_s8 = inlined_call_operand.vmem [shape: f32[1,16], index: 8, kind: input, shape index: {}]   ;;  %s893_s9 = inlined_call_operand.hbm [shape: f32[8,16], index: 9, kind: output, shape index: {}]  }
   0x1   :  { %15 = vsyncpa [#allocation6], 0 }
   0x2   :  { %16 = vsyncpa [#allocation4], 0  ;;  %s721_s30 = smov [#allocation2]  }
   0x3   :  { %s24_s10 = sshll.u32 %s721_s30, 4  ;;  %s25_s10 = int_to_ptr.vmem [resolvable:$true] %s24_s10 }
   0x4   :  { %s663_s11 = scalar_lea.vmem %s25_s10, 256  ;;  %p668_p1 = scmp.lt.s32.totalorder %s25_s10, %s25_s10 }
   0x5   :  { %p664_p0 = scmp.ne.s32.totalorder %s25_s10, %s663_s11  ;;  %p669_p2 = scmp.lt.s32.totalorder %s663_s11, %s663_s11 }
   0x7   :  { %p670_p3 = por %p669_p2, %p668_p1 }
   0x9   :  { %p671_p4 = pnand %p670_p3, %p664_p0 }
   0xb   :  { %674 = shalt.err (!%p671_p4)
}
   0xc   :  { %s722_s12 = smov 64   ;;  %s723_s13 = smov 4  }
   0xd   :  { %30 = dma.hbm_to_vmem [thread:$0]  %s885_s1, 256, %s25_s10, [#allocation3], %s722_s12, %s722_s12, %s723_s13  }
   0xe   :  { %s724_s16 = smov [#allocation5]  }
   0xf   :  { %s42_s17 = sshll.u32 %s724_s16, 4  ;;  %s43_s17 = int_to_ptr.vmem [resolvable:$true] %s42_s17 }
  0x10   :  { %s683_s18 = scalar_lea.vmem %s43_s17, 1024  ;;  %p688_p6 = scmp.lt.s32.totalorder %s43_s17, %s43_s17 }
  0x11   :  { %p684_p5 = scmp.ne.s32.totalorder %s43_s17, %s683_s18  ;;  %p689_p7 = scmp.lt.s32.totalorder %s683_s18, %s683_s18 }
  0x13   :  { %p690_p8 = por %p689_p7, %p688_p6 }
  0x15   :  { %p691_p9 = pnand %p690_p8, %p684_p5 }
  0x17   :  { %694 = shalt.err (!%p691_p9)
}
  0x18   :  { %48 = dma.hbm_to_vmem [thread:$0]  %s889_s5, 1024, %s43_s17, [#allocation6], %s722_s12, %s722_s12, %s723_s13  }
  0x19   :  { %715 = dma.done.wait [#allocation3], 256  }
  0x1a   :  { %716 = vsyncadd [#allocation3], 4294967040 }
  0x1b   :  { %717 = dma.done.wait [#allocation6], 1024  }
  0x1c   :  { %718 = vsyncadd [#allocation6], 4294966272  ;;  %v725_v0 = vmov 0.0   ;;  %vm726_vm0 = vmmov 0   ;;  %v629_v1 = vld [vmem:[#allocation2 + $0x8] sm:$0xff]   ;;  %v630_v2 = vld [vmem:[#allocation2] sm:$0xff]  }
  0x1d   :  { %554 = vmatprep.subr.bf16.mxu0 %v725_v0  ;;  %558 = vmatprep.mubr.msk.bf16.mxu0 %vm726_vm0, %v725_v0  ;;  %v631_v3 = vld [vmem:[%s887_s3 + $0x38] sm:$0xff]   ;;  %vm89_vm1 = vcmask 261120   ;;  %v632_v4 = vld [vmem:[%s887_s3 + $0x30] sm:$0xff]   ;;  %v66_v5 = vld [vmem:[%s884_s0] sm:$0xf]  ;;  %vm475_vm5 = vcmask 130048  }
  0x1e   :  { %562 = vmatprep.subr.bf16.mxu1 %v725_v0  ;;  %578 = vmatprep.mubr.msk.bf16.mxu1 %vm726_vm0, %v725_v0  ;;  %v633_v6 = vld [vmem:[%s887_s3 + $0x28] sm:$0xff]   ;;  %v634_v7 = vld [vmem:[%s887_s3 + $0x20] sm:$0xff]   ;;  %v635_v8 = vld [vmem:[%s887_s3 + $0x18] sm:$0xff]  }
  0x1f   :  { %555 = vmatpush3.bf16.msra.mxu0 %v629_v1  ;;  %563 = vmatpush3.bf16.msra.mxu1 %v631_v3  ;;  %v636_v9 = vld [vmem:[%s887_s3 + $0x10] sm:$0xff]   ;;  %v637_v10 = vld [vmem:[%s887_s3 + $0x8] sm:$0xff]   ;;  %v638_v11 = vld [vmem:[%s887_s3] sm:$0xff]  }
  0x20   :  { %556 = vmatprep.subr.bf16.mxu0 %v725_v0  ;;  %564 = vmatprep.subr.bf16.mxu1 %v725_v0  ;;  %v639_v12 = vld [vmem:[#allocation5 + $0x38] sm:$0xff]   ;;  %v640_v13 = vld [vmem:[#allocation5 + $0x30] sm:$0xff]   ;;  %v641_v14 = vld [vmem:[#allocation5 + $0x28] sm:$0xff]  }
  0x21   :  { %v642_v15 = vld [vmem:[#allocation5 + $0x20] sm:$0xff]   ;;  %v643_v16 = vld [vmem:[#allocation5 + $0x18] sm:$0xff]   ;;  %v644_v17 = vld [vmem:[#allocation5 + $0x10] sm:$0xff]  }
  0x22   :  { %v493_v18 = vld [vmem:[%s886_s2] ss:$0 sm:$0xff]  ;;  %v645_v27 = vld [vmem:[#allocation5 + $0x8] sm:$0xff]   ;;  %v646_v28 = vld [vmem:[#allocation5] sm:$0xff]  }
  0x23   :  { %557 = vmatpush3.bf16.msra.mxu0 %v630_v2  ;;  %565 = vmatpush3.bf16.msra.mxu1 %v632_v4  ;;  %v647_v29 = vld [vmem:[%s891_s7 + $0x38] sm:$0xff]   ;;  %v648_v30 = vld [vmem:[%s891_s7 + $0x30] sm:$0xff]   ;;  %v649_v31 = vld [vmem:[%s891_s7 + $0x28] sm:$0xff]  }
  0x24   :  { %582 = vmatprep.subr.bf16.mxu0 %v725_v0  ;;  %566 = vmatprep.subr.bf16.mxu1 %v725_v0  ;;  %v650_v32 = vld [vmem:[%s891_s7 + $0x20] sm:$0xff]   ;;  %v651_v33 = vld [vmem:[%s891_s7 + $0x18] sm:$0xff]   ;;  %v652_v34 = vld [vmem:[%s891_s7 + $0x10] sm:$0xff]  }
  0x25   :  { %v497_v35 = vld [vmem:[%s888_s4] ss:$0 sm:$0xff]  ;;  %v653_v44 = vld [vmem:[%s891_s7 + $0x8] sm:$0xff]  }
  0x26   :  { %559 = vmatmul.mubr.msk.bf16.vlgmr.msra.gmra.mxu0 %vm89_vm1, %v66_v5  ;;  %v654_v45 = vld [vmem:[%s891_s7] sm:$0xff]   ;;  %s727_s7 = smov [#allocation7]  }
  0x27   :  { %598 = vmatprep.mubr.msk.bf16.mxu0 %vm726_vm0, %v725_v0  ;;  %567 = vmatpush3.bf16.msra.mxu1 %v633_v6  ;;  %v506_v46 = vld [vmem:[%s890_s6] ss:$0 sm:$0xff]  ;;  %s483_s12 = sshll.u32 %s727_s7, 4  ;;  %s484_s12 = int_to_ptr.vmem [resolvable:$true] %s483_s12 }
  0x28   :  { %568 = vmatprep.subr.bf16.mxu1 %v725_v0  ;;  %583 = vmatpush3.bf16.msra.mxu0 %v639_v12  ;;  %v515_v55 = vld [vmem:[%s892_s8] ss:$0 sm:$0xff]  ;;  %s695_s6 = scalar_lea.vmem %s484_s12, 128  ;;  %p700_p11 = scmp.lt.s32.totalorder %s484_s12, %s484_s12 }
  0x29   :  { %584 = vmatprep.subr.bf16.mxu0 %v725_v0  ;;  %p696_p10 = scmp.ne.s32.totalorder %s484_s12, %s695_s6  ;;  %p701_p12 = scmp.lt.s32.totalorder %s695_s6, %s695_s6 }
  0x2b   :  { %569 = vmatpush3.bf16.msra.mxu1 %v634_v7  ;;  %p702_p13 = por %p701_p12, %p700_p11 }
  0x2c   :  { %570 = vmatprep.subr.bf16.mxu1 %v725_v0  ;;  %585 = vmatpush3.bf16.msra.mxu0 %v640_v13 }
  0x2d   :  { %586 = vmatprep.subr.bf16.mxu0 %v725_v0  ;;  %p703_p0 = pnand %p702_p13, %p696_p10 }
  0x2f   :  { %571 = vmatpush3.bf16.msra.mxu1 %v635_v8 }
  0x30   :  { %572 = vmatprep.subr.bf16.mxu1 %v725_v0  ;;  %587 = vmatpush3.bf16.msra.mxu0 %v641_v14 }
  0x31   :  { %588 = vmatprep.subr.bf16.mxu0 %v725_v0 }
  0x33   :  { %573 = vmatpush3.bf16.msra.mxu1 %v636_v9 }
  0x34   :  { %574 = vmatprep.subr.bf16.mxu1 %v725_v0  ;;  %589 = vmatpush3.bf16.msra.mxu0 %v642_v15 }
  0x35   :  { %590 = vmatprep.subr.bf16.mxu0 %v725_v0 }
  0x37   :  { %575 = vmatpush3.bf16.msra.mxu1 %v637_v10 }
  0x38   :  { %576 = vmatprep.subr.bf16.mxu1 %v725_v0  ;;  %591 = vmatpush3.bf16.msra.mxu0 %v643_v16 }
  0x39   :  { %592 = vmatprep.subr.bf16.mxu0 %v725_v0 }
  0x3b   :  { %577 = vmatpush3.bf16.msra.mxu1 %v638_v11 }
  0x3c   :  { %602 = vmatprep.subr.bf16.mxu1 %v725_v0  ;;  %593 = vmatpush3.bf16.msra.mxu0 %v644_v17 }
  0x3d   :  { %594 = vmatprep.subr.bf16.mxu0 %v725_v0 }
  0x40   :  { %595 = vmatpush3.bf16.msra.mxu0 %v645_v27 }
  0x41   :  { %596 = vmatprep.subr.bf16.mxu0 %v725_v0 }
  0x44   :  { %597 = vmatpush3.bf16.msra.mxu0 %v646_v28 }
  0xe6   :  { %v127_v19 = vpop.f32.mrf.mxu0 }
  0xe7   :  { %v128_v20 = vadd.f32 %v493_v18, %v127_v19 }
  0xe8   :  { %v560_v21 = vpop.f32.mrf.mxu0 }
  0xe9   :  { %vm133_vm2 = vcmp.gt.f32.partialorder %v128_v20, 0.0  ;;  %v134_v22 = vmul.f32 0.01, %v128_v20 }
  0xea   :  { %v130_v23 = vpop.f32.mrf.mxu0 }
  0xeb   :  { %v135_v24 = vsel %vm133_vm2, %v128_v20, %v134_v22 }
  0xec   :  { %v561_v25 = vpop.f32.mrf.mxu0  ;;  %v136_v26 = vpack.c.bf16 %v135_v24, %v135_v24 }
  0xee   :  { %579 = vmatmul.mubr.bf16.vlgmr.msra.gmra.mxu1 %v136_v26 }
  0xef   :  { %618 = vmatprep.mubr.msk.bf16.mxu1 %vm726_vm0, %v725_v0  ;;  %603 = vmatpush3.bf16.msra.mxu1 %v647_v29 }
  0xf0   :  { %604 = vmatprep.subr.bf16.mxu1 %v725_v0 }
  0xf3   :  { %605 = vmatpush3.bf16.msra.mxu1 %v648_v30 }
  0xf4   :  { %606 = vmatprep.subr.bf16.mxu1 %v725_v0 }
  0xf7   :  { %607 = vmatpush3.bf16.msra.mxu1 %v649_v31 }
  0xf8   :  { %608 = vmatprep.subr.bf16.mxu1 %v725_v0 }
  0xfb   :  { %609 = vmatpush3.bf16.msra.mxu1 %v650_v32 }
  0xfc   :  { %610 = vmatprep.subr.bf16.mxu1 %v725_v0 }
  0xff   :  { %611 = vmatpush3.bf16.msra.mxu1 %v651_v33 }
 0x100   :  { %612 = vmatprep.subr.bf16.mxu1 %v725_v0 }
 0x103   :  { %613 = vmatpush3.bf16.msra.mxu1 %v652_v34 }
 0x104   :  { %614 = vmatprep.subr.bf16.mxu1 %v725_v0 }
 0x107   :  { %615 = vmatpush3.bf16.msra.mxu1 %v653_v44 }
 0x108   :  { %616 = vmatprep.subr.bf16.mxu1 %v725_v0 }
 0x10b   :  { %617 = vmatpush3.bf16.msra.mxu1 %v654_v45 }
 0x1ae   :  { %v241_v36 = vpop.f32.mrf.mxu1 }
 0x1af   :  { %v242_v37 = vadd.f32 %v497_v35, %v241_v36 }
 0x1b0   :  { %v580_v38 = vpop.f32.mrf.mxu1 }
 0x1b1   :  { %vm247_vm3 = vcmp.gt.f32.partialorder %v242_v37, 0.0  ;;  %v248_v39 = vmul.f32 0.01, %v242_v37 }
 0x1b2   :  { %v244_v40 = vpop.f32.mrf.mxu1 }
 0x1b3   :  { %v249_v41 = vsel %vm247_vm3, %v242_v37, %v248_v39 }
 0x1b4   :  { %v250_v42 = vpack.c.bf16 %v249_v41, %v249_v41  ;;  %v581_v43 = vpop.f32.mrf.mxu1 }
 0x1b6   :  { %599 = vmatmul.mubr.bf16.vlgmr.msra.gmra.mxu0 %v250_v42 }
 0x276   :  { %v355_v47 = vpop.f32.mrf.mxu0 }
 0x277   :  { %v356_v48 = vadd.f32 %v506_v46, %v355_v47 }
 0x278   :  { %v600_v49 = vpop.f32.mrf.mxu0 }
 0x279   :  { %vm361_vm4 = vcmp.gt.f32.partialorder %v356_v48, 0.0  ;;  %v362_v50 = vmul.f32 0.01, %v356_v48 }
 0x27a   :  { %v358_v51 = vpop.f32.mrf.mxu0 }
 0x27b   :  { %v363_v52 = vsel %vm361_vm4, %v356_v48, %v362_v50 }
 0x27c   :  { %v364_v53 = vpack.c.bf16 %v363_v52, %v363_v52  ;;  %v601_v54 = vpop.f32.mrf.mxu0 }
 0x27e   :  { %619 = vmatmul.mubr.bf16.vlgmr.msra.gmra.mxu1 %v364_v53 }
 0x33e   :  { %v469_v56 = vpop.f32.mrf.mxu1 }
 0x33f   :  { %v470_v57 = vadd.f32 %v515_v55, %v469_v56 }
 0x340   :  { %v620_v58 = vpop.f32.mrf.mxu1 }
 0x341   :  { %476 = vst.msk [vmem:[#allocation7] sm:$0xff] %vm475_vm5, %v470_v57 }
 0x342   :  { %v472_v59 = vpop.f32.mrf.mxu1 }
 0x343   :  { %706 = shalt.err (!%p703_p0)
}
 0x344   :  { %486 = dma.vmem_to_hbm [thread:$0]  %s484_s12, 128, %s893_s9, [#allocation4]   ;;  %v621_v60 = vpop.f32.mrf.mxu1 }
 0x345   :  { %719 = dma.done.wait [#allocation4], 128  }
 0x346   :  { %720 = vsyncadd [#allocation4], 4294967168 }
 0x347   :  { %490 = vsyncpa [#allocation3], 1 }
 0x348   :  { %491 = vsyncpa [#allocation6], 1 }
 0x349   :  { %492 = vsyncpa [#allocation4], 1 }

</bundles_post_ra>
